<compile_context>
chip_gen: v7x
topology: tpu7x:2x2x1
jax: 0.10.0
libtpu: 0.0.40
codegen_flags: <defaults>
</compile_context>

<pallas_src>
import functools
import math

import jax
import jax.numpy as jnp
from jax import lax
from jax.experimental import pallas as pl
from jax.experimental.pallas import tpu as pltpu

N_ITER = 30  # ~27 halvings of an O(1) bracket already hits the f32 floor.


# ----------------------------------------------------------------------------
# AlphaChooser.forward  (the spec module)
# ----------------------------------------------------------------------------
def _alpha_chooser_kernel(pre_ref, alpha_ref):
    p = pre_ref[...].astype(jnp.float32)
    sig = 1.0 / (1.0 + jnp.exp(-p))            # torch.sigmoid
    alpha = jnp.clip(1.0 + sig, 1.01, 2.0)     # torch.clamp(min=1.01, max=2)
    alpha_ref[...] = alpha.astype(alpha_ref.dtype)


def alpha_chooser_forward(pre_alpha):
    """AlphaChooser.forward(): clamp(1 + sigmoid(pre_alpha), 1.01, 2)."""
    pre_alpha = jnp.asarray(pre_alpha)
    h = pre_alpha.shape[-1]
    pre2 = pre_alpha.reshape(1, h)
    out = pl.pallas_call(
        _alpha_chooser_kernel,
        out_shape=jax.ShapeDtypeStruct((1, h), jnp.float32),
        in_specs=[pl.BlockSpec(memory_space=pltpu.MemorySpace.VMEM)],
        out_specs=pl.BlockSpec(memory_space=pltpu.MemorySpace.VMEM),
    )(pre2)
    return out.reshape(h)


# ----------------------------------------------------------------------------
# alpha-entmax (entmax_bisect) over the last axis, per-block alpha
# ----------------------------------------------------------------------------
def _entmax_bisect_kernel(alpha_ref, x_ref, o_ref, *, pre):
    """alpha_ref: SMEM (G,) scalar prefetch (one alpha per grid-axis-0 block).
    x_ref / o_ref: VMEM (1, TQ, K); normalization along the last (lane) axis."""
    g = pl.program_id(0)
    alpha = alpha_ref[g].astype(jnp.float32)
    am1 = alpha - 1.0
    d = x_ref.shape[-1]

    # alpha ~= 1: entmax degenerates to the uniform distribution -> skip the
    # bisection entirely (also keeps am1 == 0 out of 1/am1).  AlphaChooser
    # clamps alpha to [1.01, 2], so alpha < 1 never reaches this kernel.
    is_uniform = jnp.abs(am1) < 1e-6

    @pl.when(is_uniform)
    def _():
        val = math.log(1.0 / d) if pre else 1.0 / d
        o_ref[...] = jnp.full(o_ref.shape, val, dtype=o_ref.dtype)

    @pl.when(jnp.logical_not(is_uniform))
    def _():
        x = x_ref[0].astype(jnp.float32)          # (TQ, K)
        inv_am1 = 1.0 / am1                       # safe: |am1| >= 1e-6 here

        X = x * am1
        max_val = jnp.max(X, axis=-1, keepdims=True)
        tau_lo = max_val - 1.0                    # 1 ** am1
        # (1/d) ** am1, computed on a (TQ,1) vector (one EUP exp, no scalar pow)
        gp = jnp.exp(jnp.full_like(max_val, math.log(1.0 / d)) * am1)
        tau_hi = max_val - gp
        dm0 = tau_hi - tau_lo

        def _p(z):
            # clamp(z, 0) ** (1/am1) as exactly one log + one exp on the EUP
            # slot (jnp.power's generic lowering adds extra VPU selects).
            zc = jnp.maximum(z, 0.0)
            return jnp.where(zc > 0.0, jnp.exp(inv_am1 * jnp.log(zc)), 0.0)

        def body(_, carry):
            tau_lo_c, dm, _p_prev = carry
            dm = dm * 0.5
            tau_m = tau_lo_c + dm
            p_m = _p(X - tau_m)
            f_m = jnp.sum(p_m, axis=-1, keepdims=True) - 1.0
            # f_lo >= 0 always (the max element contributes exactly 1 at
            # tau_lo), so torch's (f_m * f_lo) >= 0 test reduces to f_m >= 0.
            tau_lo_c = jnp.where(f_m >= 0.0, tau_m, tau_lo_c)
            return (tau_lo_c, dm, p_m)

        _, _, p_m = lax.fori_loop(
            0, N_ITER, body, (tau_lo, dm0, jnp.zeros_like(X)), unroll=2)

        # entmax_bisect(ensure_sum_one=True): renormalize the last p_m.
        p_star = p_m / jnp.sum(p_m, axis=-1, keepdims=True)
        if pre:
            # NOTE: exact zeros in sparse outputs give -inf, matching torch.log.
            p_star = jnp.log(p_star)
        o_ref[0] = p_star.astype(o_ref.dtype)


def _round_up(a, b):
    return ((a + b - 1) // b) * b


def _row_tile(n_rows, d):
    """Rows per block: keep ~8 live f32 copies of the tile under ~12 MiB so
    the tile set fits the smallest default scoped-VMEM limit (v5e 16 MiB,
    v7x 32 MiB scoped / 64 MiB physical) without raising vmem_limit_bytes."""
    budget = (12 * 1024 * 1024) // (8 * 4 * max(d, 1))
    budget = max(8, min(512, budget))   # 512 cap also amortizes ~0.35us/step
    if n_rows <= budget:
        return n_rows
    return max(8, (budget // 8) * 8)


def entmax_alpha(att_scores, alpha, *, dim=-1, pre=False):
    """entmax_bisect(att_scores, alpha, dim) with alpha either a scalar or a
    per-head vector [H] for 4-D attention scores [B, H, Q, K] (dim=-1)."""
    x = jnp.asarray(att_scores)
    ndim = x.ndim
    axis = dim % ndim
    K = x.shape[axis]
    out_dtype = x.dtype

    alpha = jnp.asarray(alpha, jnp.float32)
    per_head = alpha.ndim == 1 and alpha.shape[0] > 1

    if per_head:
        if ndim != 4 or axis != ndim - 1 or alpha.shape[0] != x.shape[1]:
            raise NotImplementedError(
                "per-head alpha expects [B, H, Q, K] scores with dim=-1")
        B, H, Q, _ = x.shape
        G = B * H
        xg = x.reshape(G, Q, K)
        alpha_g = jnp.tile(alpha, B)            # alpha_g[b*H + h] == alpha[h]
        tq = _row_tile(Q, K)
        R_pad = _round_up(Q, tq)
        if R_pad != Q:
            xg = jnp.pad(xg, ((0, 0), (0, R_pad - Q), (0, 0)))
    else:
        # Single alpha for the whole tensor; dim=-1 is the fast path (no HBM
        # transpose), other dims pay one moveaxis here.
        if axis != ndim - 1:
            x = jnp.moveaxis(x, axis, -1)
        moved_shape = x.shape
        M = math.prod(moved_shape[:-1])
        x2 = x.reshape(M, K)
        tq = _row_tile(M, K)
        if tq == M and M >= 16:
            # Split into >= 2 row tiles so both v7x TensorCores get work.
            tq = max(8, _round_up((M + 1) // 2, 8))
        M_pad = _round_up(M, tq)
        if M_pad != M:
            x2 = jnp.pad(x2, ((0, M_pad - M), (0, 0)))
        G = M_pad // tq
        xg = x2.reshape(G, tq, K)
        alpha_g = jnp.full((G,), alpha.reshape(()), dtype=jnp.float32)
        R_pad = tq

    grid = (G, R_pad // tq)

    out_g = pl.pallas_call(
        functools.partial(_entmax_bisect_kernel, pre=pre),
        out_shape=jax.ShapeDtypeStruct((G, R_pad, K), out_dtype),
        grid_spec=pltpu.PrefetchScalarGridSpec(
            num_scalar_prefetch=1,
            grid=grid,
            in_specs=[pl.BlockSpec((1, tq, K), lambda g, r, a_ref: (g, r, 0))],
            out_specs=pl.BlockSpec((1, tq, K), lambda g, r, a_ref: (g, r, 0)),
        ),
        compiler_params=pltpu.CompilerParams(
            dimension_semantics=("parallel", "parallel")),
    )(alpha_g, xg)

    if per_head:
        return out_g[:, :x.shape[2], :].reshape(x.shape)
    out2 = out_g.reshape(G * tq, K)[:M]
    out = out2.reshape(moved_shape)
    if axis != ndim - 1:
        out = jnp.moveaxis(out, -1, axis)
    return out


# ----------------------------------------------------------------------------
# Pure-JAX reference (torch entmax_bisect algorithm) for sanity checking
# ----------------------------------------------------------------------------
def _entmax_bisect_ref(x, alpha, axis=-1, n_iter=N_ITER):
    x = x.astype(jnp.float32)
    alpha = jnp.asarray(alpha, jnp.float32)
    d = x.shape[axis]
    am1 = alpha - 1.0
    am1_safe = jnp.where(am1 == 0.0, 1.0, am1)
    X = x * am1
    max_val = jnp.max(X, axis=axis, keepdims=True)
    tau_lo = max_val - 1.0
    tau_hi = max_val - (1.0 / d) ** am1
    p = lambda z: jnp.maximum(z, 0.0) ** (1.0 / am1_safe)
    f_lo = jnp.sum(p(X - tau_lo), axis=axis, keepdims=True) - 1.0
    dm = tau_hi - tau_lo
    p_m = jnp.zeros_like(X)
    for _ in range(n_iter):
        dm = dm / 2
        tau_m = tau_lo + dm
        p_m = p(X - tau_m)
        f_m = jnp.sum(p_m, axis=axis, keepdims=True) - 1.0
        tau_lo = jnp.where((f_m * f_lo) >= 0.0, tau_m, tau_lo)
    return p_m / jnp.sum(p_m, axis=axis, keepdims=True)


if __name__ == "__main__":
    key = jax.random.PRNGKey(0)
    k_pre, k_att = jax.random.split(key)

    head_count = 4
    B, H, Q, K = 2, head_count, 16, 16

    # nn.Parameter(torch.randn(head_count)) -> deterministic normal init here.
    pre_alpha = jax.random.normal(k_pre, (head_count,), dtype=jnp.float32)
    att_scores = jax.random.normal(k_att, (B, H, Q, K), dtype=jnp.float32)

    # --- AlphaChooser.forward (the spec module) ---
    alpha = jax.block_until_ready(alpha_chooser_forward(pre_alpha))
    alpha_ref = jnp.clip(1.0 + jax.nn.sigmoid(pre_alpha), 1.01, 2.0)
    assert alpha.shape == (head_count,)
    assert bool(jnp.allclose(alpha, alpha_ref, atol=1e-6))
    assert bool(jnp.all(alpha >= 1.01 - 1e-6)) and bool(jnp.all(alpha <= 2.0 + 1e-6))

    # --- downstream consumer: per-head alpha-entmax over the key axis ---
    p_star = jax.block_until_ready(entmax_alpha(att_scores, alpha, dim=-1))
    assert p_star.shape == att_scores.shape
    assert bool(jnp.allclose(jnp.sum(p_star, axis=-1), 1.0, atol=1e-4))
    ref = _entmax_bisect_ref(att_scores, alpha.reshape(1, H, 1, 1), axis=-1)
    assert bool(jnp.allclose(p_star, ref, atol=2e-5))

    # --- scalar alpha == 1 exercises the uniform fast path (loop skipped) ---
    p_uni = jax.block_until_ready(entmax_alpha(att_scores, jnp.float32(1.0), dim=-1))
    assert bool(jnp.allclose(p_uni, 1.0 / K, atol=1e-5))

    print("KERNEL_OK")
</pallas_src>

<mosaic_0001>
module attributes {stable_mosaic.version = 11 : i64} {
  func.func @_alpha_chooser_kernel(%arg0: memref<1x4xf32, #tpu.memory_space<vmem>>, %arg1: memref<1x4xf32, #tpu.memory_space<vmem>>) attributes {dimension_semantics = [], scalar_prefetch = 0 : i64, scratch_operands = 0 : i64, tpu.core_type = #tpu.core_type<tc>} {
    %c0 = arith.constant 0 : index
    %c0_0 = arith.constant 0 : index
    %0 = vector.load %arg0[%c0, %c0_0] : memref<1x4xf32, #tpu.memory_space<vmem>>, vector<1x4xf32>
    %cst = arith.constant 0.000000e+00 : f32
    %1 = vector.broadcast %cst : f32 to vector<1x4xf32>
    %2 = arith.subf %1, %0 : vector<1x4xf32>
    %3 = math.exp %2 : vector<1x4xf32>
    %cst_1 = arith.constant 1.000000e+00 : f32
    %4 = vector.broadcast %cst_1 : f32 to vector<1x4xf32>
    %5 = arith.addf %4, %3 : vector<1x4xf32>
    %cst_2 = arith.constant 1.000000e+00 : f32
    %6 = vector.broadcast %cst_2 : f32 to vector<1x4xf32>
    %7 = arith.divf %6, %5 : vector<1x4xf32>
    %cst_3 = arith.constant 1.000000e+00 : f32
    %8 = vector.broadcast %cst_3 : f32 to vector<1x4xf32>
    %9 = arith.addf %8, %7 : vector<1x4xf32>
    %cst_4 = arith.constant 1.010000e+00 : f32
    %cst_5 = arith.constant 2.000000e+00 : f32
    %10 = vector.broadcast %cst_4 : f32 to vector<1x4xf32>
    %11 = arith.maximumf %10, %9 : vector<1x4xf32>
    %12 = vector.broadcast %cst_5 : f32 to vector<1x4xf32>
    %13 = arith.minimumf %12, %11 : vector<1x4xf32>
    %c0_6 = arith.constant 0 : index
    %c0_7 = arith.constant 0 : index
    %14 = vector.load %arg1[%c0_6, %c0_7] : memref<1x4xf32, #tpu.memory_space<vmem>>, vector<1x4xf32>
    tpu.vector_store %arg1[%c0_6, %c0_7], %13 {strides = array<i32>} : memref<1x4xf32, #tpu.memory_space<vmem>>, vector<1x4xf32>,
    return
  }
}

</mosaic_0001>

<bundles_post_ra>
// kernel: tpu_custom_call.1
= control target key start
LH: loop header
LB: loop body
LE: loop exit
PB: predicated region body
PF: predicated region fallthrough
CT: control target
= control target key end

     0   :  { %6 = vsyncpa [#allocation3], 0  ;;  %s138_s0 = inlined_call_operand.hbm [shape: f32[1,4], index: 0, kind: input, shape index: {}]   ;;  %s139_s1 = inlined_call_operand.hbm [shape: f32[1,4], index: 1, kind: output, shape index: {}]  }
   0x1   :  { %7 = vsyncpa [#allocation4], 0  ;;  %s102_s6 = smov [#allocation2]   ;;  %s54_s10 = scalar_lea.hbm %s138_s0, 16 }
   0x2   :  { %s14_s7 = sshll.u32 %s102_s6, 4  ;;  %p55_p0 = scmp.ne.s32.totalorder %s138_s0, %s54_s10  ;;  %s15_s7 = int_to_ptr.vmem [resolvable:$true] %s14_s7 }
   0x3   :  { %p58_p1 = scmp.lt.u32.totalorder %s54_s10, %s138_s0 }
   0x5   :  { %p60_p2 = pnand %p58_p1, %p55_p0 }
   0x7   :  { %63 = shalt.err (!%p60_p2)
}
   0x8   :  { %s64_s15 = scalar_lea.vmem %s15_s7, 16  ;;  %s68_s16 = scalar_lea.vmem %s15_s7, 32 }
   0x9   :  { %p65_p3 = scmp.ne.s32.totalorder %s15_s7, %s64_s15  ;;  %p69_p4 = scmp.lt.s32.totalorder %s15_s7, %s15_s7 }
   0xa   :  { %p70_p5 = scmp.lt.s32.totalorder %s68_s16, %s64_s15 }
   0xc   :  { %p71_p6 = por %p70_p5, %p69_p4 }
   0xe   :  { %p72_p7 = pnand %p71_p6, %p65_p3 }
  0x10   :  { %75 = shalt.err (!%p72_p7)
}
  0x11   :  { %17 = dma.hbm_to_vmem [thread:$0]  %s138_s0, 16, %s15_s7, [#allocation3]  }
  0x12   :  { %98 = dma.done.wait [#allocation3], 16  }
  0x13   :  { %99 = vsyncadd [#allocation3], 4294967280  ;;  %v21_v0 = vld [vmem:[#allocation2] sm:$0x1]  ;;  %s103_s19 = smov [#allocation5]   ;;  %vm31_vm0 = vcmask 24576  }
  0x14   :  { %v22_v1 = vsub.f32 0.0, %v21_v0  ;;  %s39_s20 = sshll.u32 %s103_s19, 4  ;;  %s40_s20 = int_to_ptr.vmem [resolvable:$true] %s39_s20 }
  0x15   :  { %s76_s21 = scalar_lea.vmem %s40_s20, 16  ;;  %s80_s0 = scalar_lea.vmem %s40_s20, 32 }
  0x16   :  { %v23_v2 = vmul.f32 1.442695, %v22_v1  ;;  %p77_p8 = scmp.ne.s32.totalorder %s40_s20, %s76_s21  ;;  %p81_p9 = scmp.lt.s32.totalorder %s40_s20, %s40_s20 }
  0x17   :  { %p82_p10 = scmp.lt.s32.totalorder %s80_s0, %s76_s21 }
  0x18   :  { %50 = vpow2.f32 %v23_v2 }
  0x19   :  { %p83_p11 = por %p82_p10, %p81_p9 }
  0x1b   :  { %p84_p12 = pnand %p83_p11, %p77_p8 }
  0x22   :  { %v51_v3 = vpop.eup %50 }
  0x23   :  { %v25_v4 = vadd.f32 1.0, %v51_v3 }
  0x25   :  { %52 = vrcp.f32 %v25_v4 }
  0x2f   :  { %v53_v5 = vpop.eup %52 }
  0x30   :  { %v28_v6 = vadd.f32 1.0, %v53_v5 }
  0x32   :  { %v29_v7 = vmax.f32 %v28_v6, 1.01 }
  0x34   :  { %v30_v8 = vmin.f32 %v29_v7, 2.0 }
  0x36   :  { %32 = vst.msk [vmem:[#allocation5] sm:$0x1] %vm31_vm0, %v30_v8 }
  0x37   :  { %87 = shalt.err (!%p84_p12)
}
  0x38   :  { %s88_s24 = scalar_lea.hbm %s139_s1, 16 }
  0x39   :  { %p89_p13 = scmp.ne.s32.totalorder %s139_s1, %s88_s24  ;;  %p92_p0 = scmp.lt.u32.totalorder %s88_s24, %s139_s1 }
  0x3b   :  { %p94_p1 = pnand %p92_p0, %p89_p13 }
  0x3d   :  { %97 = shalt.err (!%p94_p1)
}
  0x3e   :  { %42 = dma.vmem_to_hbm [thread:$0]  %s40_s20, 16, %s139_s1, [#allocation4]  }
  0x3f   :  { %100 = dma.done.wait [#allocation4], 16  }
  0x40   :  { %101 = vsyncadd [#allocation4], 4294967280 }
  0x41   :  { %46 = vsyncpa [#allocation3], 1 }
  0x42   :  { %47 = vsyncpa [#allocation4], 1 }

</bundles_post_ra>
